<compile_context>
chip_gen: v7x
topology: tpu7x:2x2x1
jax: 0.10.0
libtpu: 0.0.40
codegen_flags: <defaults>
</compile_context>

<pallas_src>
import math

import jax
import jax.numpy as jnp
from jax.experimental import pallas as pl
from jax.experimental.pallas import tpu as pltpu

LANE = 128     # vreg lane width
SUBLANE = 8    # f32 sublane granule


def _round_up(x: int, m: int) -> int:
    return ((x + m - 1) // m) * m


# --------------------------------------------------------------------------- kernel

def _make_kernel(num_layers: int, hp: int, gate_dtype):
    """Fused encoder: num_layers x (1-step LSTM cell, zero state, embedding folded into layer 0)
    -> meta linear.  Gate blocks are packed (i, g, o), each `hp` (multiple of 128) lanes wide, so
    every slice is lane aligned.  `gate_dtype` controls the dtype of the sigmoid/tanh passes
    (bf16 on v6e/v7x to relieve the single EUP slot; f32 on v5e)."""

    def kernel(*refs):
        # refs: x, [W_l, b_l] * num_layers, W_meta, b_meta, out
        x_ref = refs[0]
        layer_refs = refs[1:1 + 2 * num_layers]
        wmeta_ref, bmeta_ref, out_ref = refs[-3], refs[-2], refs[-1]

        # Embedding Linear is folded into layer 0 (done host-side); start from the raw observation.
        inp = x_ref[...]

        for l in range(num_layers):
            w_ref, b_ref = layer_refs[2 * l], layer_refs[2 * l + 1]
            w = w_ref[...]
            gates = (
                jnp.dot(inp.astype(w.dtype), w, preferred_element_type=jnp.float32)
                + b_ref[...]
            )
            ga = gates.astype(gate_dtype)
            # Packed gate order (i, g, o); each block `hp` lanes wide -> 128-lane-aligned slices.
            i_g = jax.nn.sigmoid(ga[:, 0 * hp:1 * hp])
            g_g = jnp.tanh(ga[:, 1 * hp:2 * hp])
            o_g = jax.nn.sigmoid(ga[:, 2 * hp:3 * hp])
            c = i_g * g_g                    # c0 = 0  =>  f * c_prev vanishes
            inp = o_g * jnp.tanh(c)          # h, input to the next layer

        # meta_layer = nn.Linear(hidden_size, output_size)  (output padded to lane-dense width)
        w_meta = wmeta_ref[...]
        out = (
            jnp.dot(inp.astype(w_meta.dtype), w_meta, preferred_element_type=jnp.float32)
            + bmeta_ref[...]
        )
        out_ref[...] = out.astype(out_ref.dtype)

    return kernel


# --------------------------------------------------------------------------- params

def init_params(key, input_size, output_size, hidden_size, embedding_size, num_layers):
    """PyTorch-style uniform init; weights stored transposed to (in, out).  W_hh is kept here so the
    pure-JAX reference can use it, even though the fused kernel never needs it (1-step, zero state)."""
    params = {}
    ks = iter(jax.random.split(key, 4 + 4 * num_layers))

    def unif(k, shape, bound):
        return jax.random.uniform(k, shape, jnp.float32, -bound, bound)

    b_emb = 1.0 / math.sqrt(input_size)
    params["W_emb"] = unif(next(ks), (input_size, embedding_size), b_emb)
    params["b_emb"] = unif(next(ks), (1, embedding_size), b_emb)

    b_lstm = 1.0 / math.sqrt(hidden_size)
    params["lstm"] = []
    for l in range(num_layers):
        in_dim = embedding_size if l == 0 else hidden_size
        W_ih = unif(next(ks), (in_dim, 4 * hidden_size), b_lstm)
        W_hh = unif(next(ks), (hidden_size, 4 * hidden_size), b_lstm)
        b_ih = unif(next(ks), (1, 4 * hidden_size), b_lstm)
        b_hh = unif(next(ks), (1, 4 * hidden_size), b_lstm)
        params["lstm"].append((W_ih, W_hh, b_ih, b_hh))

    b_meta = 1.0 / math.sqrt(hidden_size)
    params["W_meta"] = unif(next(ks), (hidden_size, output_size), b_meta)
    params["b_meta"] = unif(next(ks), (1, output_size), b_meta)
    return params


def prepare_kernel_params(params, *, hidden_size, num_layers, output_size,
                          weight_dtype=jnp.float32):
    """Repack PyTorch-style params for the kernel.

    Dead-work removal is valid ONLY because the PyTorch forward runs the LSTM for a single
    timestep from the default zero initial state:
        h0 = c0 = 0  =>  h_prev @ W_hh == 0  and  f * c_prev == 0,
    so W_hh and the forget-gate columns never influence the output.

    Padding safety: padded gate lanes have zero weight columns and zero bias, so their
    pre-activation is exactly 0 -> sigmoid(0)=0.5 gets multiplied by tanh(0)=0; and the padded
    weight *rows* [H:Hp) of the next layer / meta layer are zero, so padded h lanes never
    propagate.  Do not change the gate packing or padding without revisiting both facts.

    Also: the embedding Linear is folded into layer 0 (composed in f32 at HIGHEST precision
    before any bf16 cast), and each layer gets one pre-summed bias b_ih + b_hh.
    """
    H = hidden_size
    Hp = _round_up(H, LANE)
    Op = _round_up(output_size, LANE)
    assert Hp >= H and Op >= output_size

    gate_order = (0, 2, 3)  # PyTorch gate order is (i, f, g, o); keep only (i, g, o)
    layers = []
    for l in range(num_layers):
        W_ih, _W_hh, b_ih, b_hh = params["lstm"][l]     # W_hh is dead (see docstring)
        in_dim = W_ih.shape[0]
        in_p = in_dim if l == 0 else Hp                 # layer 0 contracts over embedding_size
        b_sum = b_ih + b_hh
        W_pad = jnp.zeros((in_p, 3 * Hp), jnp.float32)
        b_pad = jnp.zeros((1, 3 * Hp), jnp.float32)
        for slot, g in enumerate(gate_order):
            W_pad = W_pad.at[:in_dim, slot * Hp:slot * Hp + H].set(W_ih[:, g * H:(g + 1) * H])
            b_pad = b_pad.at[:, slot * Hp:slot * Hp + H].set(b_sum[:, g * H:(g + 1) * H])
        if l == 0:
            # Fold the embedding Linear into the layer-0 gate projection (exact composition).
            # IMPORTANT: compose in f32 at HIGHEST precision BEFORE any bf16 cast.
            hi = jax.lax.Precision.HIGHEST
            b_pad = jnp.dot(params["b_emb"], W_pad, precision=hi) + b_pad
            W_pad = jnp.dot(params["W_emb"], W_pad, precision=hi)
        layers.append((W_pad.astype(weight_dtype), b_pad))   # biases stay f32 (post-accum add)

    W_meta = jnp.zeros((Hp, Op), jnp.float32).at[:H, :output_size].set(params["W_meta"])
    b_meta = jnp.zeros((1, Op), jnp.float32).at[:, :output_size].set(params["b_meta"])

    return {
        "lstm": layers,
        "W_meta": W_meta.astype(weight_dtype),
        "b_meta": b_meta,
        "Hp": Hp,
        "Op": Op,
    }


# --------------------------------------------------------------------------- forward

def environment_encoder_forward(observation, kparams, *, num_layers, output_size,
                                tile_b=512, out_dtype=jnp.float32,
                                gate_dtype=jnp.float32):
    """Pallas forward. observation: (B, input_size) f32 -> (B, 1, output_size) of `out_dtype`."""
    B, input_size = observation.shape
    Hp, Op = kparams["Hp"], kparams["Op"]

    # Batch tiling: large tiles amortize per-grid-step overhead (~0.35 us/step), but cap the tile
    # at half of the (sublane-rounded) batch so the "parallel" batch axis keeps >= 2 grid steps
    # whenever possible -> both v7x TensorCores get work.  Harmless on v5e/v6e (1 TC).
    B8 = _round_up(max(B, 1), SUBLANE)
    half = _round_up(pl.cdiv(B8, 2), SUBLANE)
    TILE_B = max(SUBLANE, min(_round_up(tile_b, SUBLANE), half))
    B_pad = _round_up(B, TILE_B)
    if B_pad != B:
        observation = jnp.pad(observation, ((0, B_pad - B), (0, 0)))
    grid = (B_pad // TILE_B,)

    flat_inputs = [observation]
    for (W_l, b_l) in kparams["lstm"]:
        flat_inputs += [W_l, b_l]
    flat_inputs += [kparams["W_meta"], kparams["b_meta"]]

    def resident(arr):
        # Whole-array block + constant index map -> stays VMEM-resident across grid steps
        # (no re-DMA).  TODO(synk): pipeline_mode=pl.Buffered(1) / per-layer weight streaming for
        # very large hidden sizes on v7x (64 MiB VMEM).
        return pl.BlockSpec(arr.shape, lambda i: (0,) * arr.ndim)

    in_specs = [pl.BlockSpec((TILE_B, input_size), lambda i: (i, 0))]
    in_specs += [resident(a) for a in flat_inputs[1:]]
    # Lane-dense output block (Op % 128 == 0) -> unmasked stores and dense HBM writeback;
    # out_dtype=bf16 halves the writeback bytes (the dominant HBM traffic at large TILE_B).
    out_spec = pl.BlockSpec((TILE_B, Op), lambda i: (i, 0))

    out = pl.pallas_call(
        _make_kernel(num_layers, Hp, gate_dtype),
        out_shape=jax.ShapeDtypeStruct((B_pad, Op), out_dtype),
        grid=grid,
        in_specs=in_specs,
        out_specs=out_spec,
        compiler_params=pltpu.CompilerParams(
            dimension_semantics=("parallel",),
            # 32 MiB: raises the v5e default (16 MiB), matches the v6e/v7x default, and leaves
            # headroom below v7x's 64 MiB physical VMEM even at TILE_B=1024.
            vmem_limit_bytes=32 * 1024 * 1024,
        ),
    )(*flat_inputs)

    # Drop batch/feature padding; PyTorch returns (B, 1, output_size) due to .view(B, 1, -1).
    return out[:B, :output_size].reshape(B, 1, output_size)


# --------------------------------------------------------------------------- reference

def reference_forward(observation, params, *, hidden_size, num_layers):
    """Pure-JAX f32 reference replicating the full PyTorch forward (incl. W_hh and f-gate)."""
    H = hidden_size
    B = observation.shape[0]
    inp = observation @ params["W_emb"] + params["b_emb"]
    h_prev = jnp.zeros((B, H), jnp.float32)
    c_prev = jnp.zeros((B, H), jnp.float32)
    for l in range(num_layers):
        W_ih, W_hh, b_ih, b_hh = params["lstm"][l]
        gates = inp @ W_ih + h_prev @ W_hh + b_ih + b_hh
        i = jax.nn.sigmoid(gates[:, 0 * H:1 * H])
        f = jax.nn.sigmoid(gates[:, 1 * H:2 * H])
        g = jnp.tanh(gates[:, 2 * H:3 * H])
        o = jax.nn.sigmoid(gates[:, 3 * H:4 * H])
        c = f * c_prev + i * g
        h = o * jnp.tanh(c)
        inp = h
    out = inp @ params["W_meta"] + params["b_meta"]
    return out.reshape(B, 1, -1)


# --------------------------------------------------------------------------- demo

if __name__ == "__main__":
    input_size = 16
    embedding_size = 32
    hidden_size = 32
    output_size = 8
    num_layers = 2
    batch_size = 2

    key = jax.random.PRNGKey(0)
    k_obs, k_params = jax.random.split(key)

    observation = jax.random.normal(k_obs, (batch_size, input_size), jnp.float32)
    params = init_params(
        k_params, input_size, output_size, hidden_size, embedding_size, num_layers
    )
    ref = reference_forward(observation, params, hidden_size=hidden_size, num_layers=num_layers)

    # bf16 EUP gate math only on v6e / v7x (v5e has no bf16 EUP/VPU).
    device_kind = jax.devices()[0].device_kind.lower()
    bf16_gates_ok = ("v6" in device_kind) or ("v7" in device_kind)

    # f32 weight path (exact-precision check against the reference).
    kp_f32 = prepare_kernel_params(
        params, hidden_size=hidden_size, num_layers=num_layers,
        output_size=output_size, weight_dtype=jnp.float32,
    )
    out_f32 = environment_encoder_forward(
        observation, kp_f32, num_layers=num_layers, output_size=output_size,
        out_dtype=jnp.float32, gate_dtype=jnp.float32,
    )
    out_f32 = jax.block_until_ready(out_f32)
    assert out_f32.shape == (batch_size, 1, output_size), out_f32.shape
    assert jnp.allclose(out_f32, ref, rtol=1e-5, atol=2e-5), float(jnp.max(jnp.abs(out_f32 - ref)))

    # bf16 weight path (v6e / v7x): bf16 weights + bf16 output (halves DMA bytes both ways) and,
    # where supported, bf16 gate nonlinearities.  Accumulation stays f32.
    kp_bf16 = prepare_kernel_params(
        params, hidden_size=hidden_size, num_layers=num_layers,
        output_size=output_size, weight_dtype=jnp.bfloat16,
    )
    out_bf16 = environment_encoder_forward(
        observation, kp_bf16, num_layers=num_layers, output_size=output_size,
        out_dtype=jnp.bfloat16,
        gate_dtype=jnp.bfloat16 if bf16_gates_ok else jnp.float32,
    )
    out_bf16 = jax.block_until_ready(out_bf16)
    assert out_bf16.shape == (batch_size, 1, output_size), out_bf16.shape
    assert jnp.allclose(out_bf16.astype(jnp.float32), ref, rtol=5e-2, atol=5e-2), \
        float(jnp.max(jnp.abs(out_bf16.astype(jnp.float32) - ref)))

    print("KERNEL_OK")
</pallas_src>

<mosaic_0001>
module attributes {stable_mosaic.version = 11 : i64} {
  func.func @kernel(%arg0: i32, %arg1: memref<8x16xf32, #tpu.memory_space<vmem>>, %arg2: memref<16x384xf32, #tpu.memory_space<vmem>>, %arg3: memref<1x384xf32, #tpu.memory_space<vmem>>, %arg4: memref<128x384xf32, #tpu.memory_space<vmem>>, %arg5: memref<1x384xf32, #tpu.memory_space<vmem>>, %arg6: memref<128x128xf32, #tpu.memory_space<vmem>>, %arg7: memref<1x128xf32, #tpu.memory_space<vmem>>, %arg8: memref<8x128xf32, #tpu.memory_space<vmem>>) attributes {dimension_semantics = [#tpu.dimension_semantics<parallel>], iteration_bounds = array<i64: 1>, scalar_prefetch = 0 : i64, scratch_operands = 0 : i64, tpu.core_type = #tpu.core_type<tc>, window_params = [{transform_indices = @transform_0, window_bounds = array<i64: 8, 16>}, {pipeline_mode = #tpu.pipeline_mode<synchronous>, transform_indices = @transform_1, window_bounds = array<i64: 16, 384>}, {pipeline_mode = #tpu.pipeline_mode<synchronous>, transform_indices = @transform_2, window_bounds = array<i64: 1, 384>}, {pipeline_mode = #tpu.pipeline_mode<synchronous>, transform_indices = @transform_3, window_bounds = array<i64: 128, 384>}, {pipeline_mode = #tpu.pipeline_mode<synchronous>, transform_indices = @transform_4, window_bounds = array<i64: 1, 384>}, {pipeline_mode = #tpu.pipeline_mode<synchronous>, transform_indices = @transform_5, window_bounds = array<i64: 128, 128>}, {pipeline_mode = #tpu.pipeline_mode<synchronous>, transform_indices = @transform_6, window_bounds = array<i64: 1, 128>}, {transform_indices = @transform_7, window_bounds = array<i64: 8, 128>}]} {
    %c0 = arith.constant 0 : index
    %c0_0 = arith.constant 0 : index
    %0 = vector.load %arg1[%c0, %c0_0] : memref<8x16xf32, #tpu.memory_space<vmem>>, vector<8x16xf32>
    %c0_1 = arith.constant 0 : index
    %c0_2 = arith.constant 0 : index
    %1 = vector.load %arg2[%c0_1, %c0_2] : memref<16x384xf32, #tpu.memory_space<vmem>>, vector<16x384xf32>
    %cst = arith.constant dense<0.000000e+00> : vector<8x384xf32>
    %2 = tpu.matmul %0, %1, %cst {dimension_numbers = #tpu.dot_dimension_numbers<[1], [0], [0], [1], [0, 0, 1, 1], [], []>} : vector<8x16xf32>, vector<16x384xf32>, vector<8x384xf32> -> vector<8x384xf32>
    %c0_3 = arith.constant 0 : index
    %c0_4 = arith.constant 0 : index
    %3 = vector.load %arg3[%c0_3, %c0_4] : memref<1x384xf32, #tpu.memory_space<vmem>>, vector<1x384xf32>
    %4 = vector.broadcast %3 : vector<1x384xf32> to vector<8x384xf32>
    %5 = arith.addf %2, %4 : vector<8x384xf32>
    %6 = vector.extract_strided_slice %5 {offsets = [0, 0], sizes = [8, 128], strides = [1, 1]} : vector<8x384xf32> to vector<8x128xf32>
    %7 = arith.negf %6 : vector<8x128xf32>
    %8 = math.exp %7 : vector<8x128xf32>
    %cst_5 = arith.constant 1.000000e+00 : f32
    %9 = vector.broadcast %cst_5 : f32 to vector<8x128xf32>
    %10 = arith.addf %9, %8 : vector<8x128xf32>
    %11 = arith.divf %9, %10 : vector<8x128xf32>
    %12 = vector.extract_strided_slice %5 {offsets = [0, 128], sizes = [8, 128], strides = [1, 1]} : vector<8x384xf32> to vector<8x128xf32>
    %13 = math.tanh %12 : vector<8x128xf32>
    %14 = vector.extract_strided_slice %5 {offsets = [0, 256], sizes = [8, 128], strides = [1, 1]} : vector<8x384xf32> to vector<8x128xf32>
    %15 = arith.negf %14 : vector<8x128xf32>
    %16 = math.exp %15 : vector<8x128xf32>
    %cst_6 = arith.constant 1.000000e+00 : f32
    %17 = vector.broadcast %cst_6 : f32 to vector<8x128xf32>
    %18 = arith.addf %17, %16 : vector<8x128xf32>
    %19 = arith.divf %17, %18 : vector<8x128xf32>
    %20 = arith.mulf %11, %13 : vector<8x128xf32>
    %21 = math.tanh %20 : vector<8x128xf32>
    %22 = arith.mulf %19, %21 : vector<8x128xf32>
    %c0_7 = arith.constant 0 : index
    %c0_8 = arith.constant 0 : index
    %23 = vector.load %arg4[%c0_7, %c0_8] : memref<128x384xf32, #tpu.memory_space<vmem>>, vector<128x384xf32>
    %cst_9 = arith.constant dense<0.000000e+00> : vector<8x384xf32>
    %24 = tpu.matmul %22, %23, %cst_9 {dimension_numbers = #tpu.dot_dimension_numbers<[1], [0], [0], [1], [0, 0, 1, 1], [], []>} : vector<8x128xf32>, vector<128x384xf32>, vector<8x384xf32> -> vector<8x384xf32>
    %c0_10 = arith.constant 0 : index
    %c0_11 = arith.constant 0 : index
    %25 = vector.load %arg5[%c0_10, %c0_11] : memref<1x384xf32, #tpu.memory_space<vmem>>, vector<1x384xf32>
    %26 = vector.broadcast %25 : vector<1x384xf32> to vector<8x384xf32>
    %27 = arith.addf %24, %26 : vector<8x384xf32>
    %28 = vector.extract_strided_slice %27 {offsets = [0, 0], sizes = [8, 128], strides = [1, 1]} : vector<8x384xf32> to vector<8x128xf32>
    %29 = arith.negf %28 : vector<8x128xf32>
    %30 = math.exp %29 : vector<8x128xf32>
    %cst_12 = arith.constant 1.000000e+00 : f32
    %31 = vector.broadcast %cst_12 : f32 to vector<8x128xf32>
    %32 = arith.addf %31, %30 : vector<8x128xf32>
    %33 = arith.divf %31, %32 : vector<8x128xf32>
    %34 = vector.extract_strided_slice %27 {offsets = [0, 128], sizes = [8, 128], strides = [1, 1]} : vector<8x384xf32> to vector<8x128xf32>
    %35 = math.tanh %34 : vector<8x128xf32>
    %36 = vector.extract_strided_slice %27 {offsets = [0, 256], sizes = [8, 128], strides = [1, 1]} : vector<8x384xf32> to vector<8x128xf32>
    %37 = arith.negf %36 : vector<8x128xf32>
    %38 = math.exp %37 : vector<8x128xf32>
    %cst_13 = arith.constant 1.000000e+00 : f32
    %39 = vector.broadcast %cst_13 : f32 to vector<8x128xf32>
    %40 = arith.addf %39, %38 : vector<8x128xf32>
    %41 = arith.divf %39, %40 : vector<8x128xf32>
    %42 = arith.mulf %33, %35 : vector<8x128xf32>
    %43 = math.tanh %42 : vector<8x128xf32>
    %44 = arith.mulf %41, %43 : vector<8x128xf32>
    %c0_14 = arith.constant 0 : index
    %c0_15 = arith.constant 0 : index
    %45 = vector.load %arg6[%c0_14, %c0_15] : memref<128x128xf32, #tpu.memory_space<vmem>>, vector<128x128xf32>
    %cst_16 = arith.constant dense<0.000000e+00> : vector<8x128xf32>
    %46 = tpu.matmul %44, %45, %cst_16 {dimension_numbers = #tpu.dot_dimension_numbers<[1], [0], [0], [1], [0, 0, 1, 1], [], []>} : vector<8x128xf32>, vector<128x128xf32>, vector<8x128xf32> -> vector<8x128xf32>
    %c0_17 = arith.constant 0 : index
    %c0_18 = arith.constant 0 : index
    %47 = vector.load %arg7[%c0_17, %c0_18] : memref<1x128xf32, #tpu.memory_space<vmem>>, vector<1x128xf32>
    %48 = vector.broadcast %47 : vector<1x128xf32> to vector<8x128xf32>
    %49 = arith.addf %46, %48 : vector<8x128xf32>
    %c0_19 = arith.constant 0 : index
    %c0_20 = arith.constant 0 : index
    %50 = vector.load %arg8[%c0_19, %c0_20] : memref<8x128xf32, #tpu.memory_space<vmem>>, vector<8x128xf32>
    tpu.vector_store %arg8[%c0_19, %c0_20], %49 {strides = array<i32>} : memref<8x128xf32, #tpu.memory_space<vmem>>, vector<8x128xf32>,
    return
  }
  func.func @transform_0(%arg0: i32) -> (i32, i32) {
    %c0_i32 = arith.constant 0 : i32
    %c0_i32_0 = arith.constant 0 : i32
    return %arg0, %c0_i32 : i32, i32
  }
  func.func @transform_1(%arg0: i32) -> (i32, i32) {
    %c0_i32 = arith.constant 0 : i32
    %c0_i32_0 = arith.constant 0 : i32
    %c0_i32_1 = arith.constant 0 : i32
    return %c0_i32, %c0_i32_0 : i32, i32
  }
  func.func @transform_2(%arg0: i32) -> (i32, i32) {
    %c0_i32 = arith.constant 0 : i32
    %c0_i32_0 = arith.constant 0 : i32
    %c0_i32_1 = arith.constant 0 : i32
    return %c0_i32, %c0_i32_0 : i32, i32
  }
  func.func @transform_3(%arg0: i32) -> (i32, i32) {
    %c0_i32 = arith.constant 0 : i32
    %c0_i32_0 = arith.constant 0 : i32
    %c0_i32_1 = arith.constant 0 : i32
    return %c0_i32, %c0_i32_0 : i32, i32
  }
  func.func @transform_4(%arg0: i32) -> (i32, i32) {
    %c0_i32 = arith.constant 0 : i32
    %c0_i32_0 = arith.constant 0 : i32
    %c0_i32_1 = arith.constant 0 : i32
    return %c0_i32, %c0_i32_0 : i32, i32
  }
  func.func @transform_5(%arg0: i32) -> (i32, i32) {
    %c0_i32 = arith.constant 0 : i32
    %c0_i32_0 = arith.constant 0 : i32
    %c0_i32_1 = arith.constant 0 : i32
    return %c0_i32, %c0_i32_0 : i32, i32
  }
  func.func @transform_6(%arg0: i32) -> (i32, i32) {
    %c0_i32 = arith.constant 0 : i32
    %c0_i32_0 = arith.constant 0 : i32
    %c0_i32_1 = arith.constant 0 : i32
    return %c0_i32, %c0_i32_0 : i32, i32
  }
  func.func @transform_7(%arg0: i32) -> (i32, i32) {
    %c0_i32 = arith.constant 0 : i32
    %c0_i32_0 = arith.constant 0 : i32
    return %arg0, %c0_i32 : i32, i32
  }
}

</mosaic_0001>

<bundles_post_ra>
// kernel: tpu_custom_call.1
= control target key start
LH: loop header
LB: loop body
LE: loop exit
PB: predicated region body
PF: predicated region fallthrough
CT: control target
= control target key end

     0   :  { %12 = vsyncpa [#allocation3], 0  ;;  %s1129_s0 = inlined_call_operand.hbm [shape: f32[8,16], index: 0, kind: input, shape index: {}]   ;;  %s1130_s1 = inlined_call_operand.hbm [shape: f32[16,384], index: 1, kind: input, shape index: {}]   ;;  %s1131_s2 = inlined_call_operand.vmem [shape: f32[1,384], index: 2, kind: input, shape index: {}]   ;;  %s1132_s3 = inlined_call_operand.hbm [shape: f32[128,384], index: 3, kind: input, shape index: {}]   ;;  %s1133_s4 = inlined_call_operand.vmem [shape: f32[1,384], index: 4, kind: input, shape index: {}]   ;;  %s1134_s5 = inlined_call_operand.hbm [shape: f32[128,128], index: 5, kind: input, shape index: {}]   ;;  %s1135_s6 = inlined_call_operand.vmem [shape: f32[1,128], index: 6, kind: input, shape index: {}]   ;;  %s1136_s7 = inlined_call_operand.hbm [shape: f32[8,128], index: 7, kind: output, shape index: {}]  }
   0x1   :  { %13 = vsyncpa [#allocation6], 0 }
   0x2   :  { %14 = vsyncpa [#allocation9], 0 }
   0x3   :  { %15 = vsyncpa [#allocation4], 0  ;;  %s960_s24 = smov [#allocation5]   ;;  %s842_s28 = scalar_lea.hbm %s1130_s1, 768 }
   0x4   :  { %s31_s25 = sshll.u32 %s960_s24, 4  ;;  %p843_p0 = scmp.ne.s32.totalorder %s1130_s1, %s842_s28  ;;  %s32_s25 = int_to_ptr.vmem [resolvable:$true] %s31_s25 }
   0x5   :  { %p846_p1 = scmp.lt.u32.totalorder %s842_s28, %s1130_s1 }
   0x7   :  { %p848_p2 = pnand %p846_p1, %p843_p0 }
   0x9   :  { %851 = shalt.err (!%p848_p2)
}
   0xa   :  { %s852_s10 = scalar_lea.vmem %s32_s25, 768  ;;  %p857_p4 = scmp.lt.s32.totalorder %s32_s25, %s32_s25 }
   0xb   :  { %p853_p3 = scmp.ne.s32.totalorder %s32_s25, %s852_s10  ;;  %p858_p5 = scmp.lt.s32.totalorder %s852_s10, %s852_s10 }
   0xd   :  { %p859_p6 = por %p858_p5, %p857_p4 }
   0xf   :  { %p860_p7 = pnand %p859_p6, %p853_p3 }
  0x11   :  { %863 = shalt.err (!%p860_p7)
}
  0x12   :  { %s961_s11 = smov 384   ;;  %s962_s12 = smov 24  }
  0x13   :  { %37 = dma.hbm_to_vmem [thread:$0]  %s1130_s1, 768, %s32_s25, [#allocation6], %s961_s11, %s961_s11, %s962_s12  }
  0x14   :  { %s963_s15 = smov [#allocation2]   ;;  %s964_s17 = smov [#allocation7]  }
  0x15   :  { %s22_s16 = sshll.u32 %s963_s15, 4  ;;  %s45_s18 = sshll.u32 %s964_s17, 4  ;;  %s23_s16 = int_to_ptr.vmem [resolvable:$true] %s22_s16  ;;  %s46_s18 = int_to_ptr.vmem [resolvable:$true] %s45_s18 }
  0x16   :  { %s864_s21 = scalar_lea.hbm %s1129_s0, 128 }
  0x17   :  { %p865_p8 = scmp.ne.s32.totalorder %s1129_s0, %s864_s21  ;;  %p868_p9 = scmp.lt.u32.totalorder %s864_s21, %s1129_s0 }
  0x19   :  { %p870_p10 = pnand %p868_p9, %p865_p8 }
  0x1b   :  { %873 = shalt.err (!%p870_p10)
}
  0x1c   :  { %s874_s1 = scalar_lea.vmem %s23_s16, 128  ;;  %p879_p12 = scmp.lt.s32.totalorder %s23_s16, %s23_s16 }
  0x1d   :  { %p875_p11 = scmp.ne.s32.totalorder %s23_s16, %s874_s1  ;;  %p880_p13 = scmp.lt.s32.totalorder %s874_s1, %s874_s1 }
  0x1f   :  { %p881_p0 = por %p880_p13, %p879_p12 }
  0x21   :  { %p882_p1 = pnand %p881_p0, %p875_p11 }
  0x23   :  { %885 = shalt.err (!%p882_p1)
}
  0x24   :  { %25 = dma.hbm_to_vmem [thread:$0]  %s1129_s0, 128, %s23_s16, [#allocation3]  }
  0x25   :  { %s886_s30 = scalar_lea.hbm %s1132_s3, 6144 }
  0x26   :  { %p887_p2 = scmp.ne.s32.totalorder %s1132_s3, %s886_s30  ;;  %p890_p3 = scmp.lt.u32.totalorder %s886_s30, %s1132_s3 }
  0x28   :  { %p892_p4 = pnand %p890_p3, %p887_p2 }
  0x2a   :  { %895 = shalt.err (!%p892_p4)
}
  0x2b   :  { %s896_s14 = scalar_lea.vmem %s46_s18, 6144  ;;  %p901_p6 = scmp.lt.s32.totalorder %s46_s18, %s46_s18 }
  0x2c   :  { %p897_p5 = scmp.ne.s32.totalorder %s46_s18, %s896_s14  ;;  %p902_p7 = scmp.lt.s32.totalorder %s896_s14, %s896_s14 }
  0x2e   :  { %p903_p8 = por %p902_p7, %p901_p6 }
  0x30   :  { %p904_p9 = pnand %p903_p8, %p897_p5 }
  0x32   :  { %907 = shalt.err (!%p904_p9)
}
  0x33   :  { %51 = dma.hbm_to_vmem [thread:$0]  %s1132_s3, 6144, %s46_s18, [#allocation6], %s961_s11, %s961_s11, %s962_s12  }
  0x34   :  { %s965_s16 = smov [#allocation8]   ;;  %s908_s21 = scalar_lea.hbm %s1134_s5, 2048 }
  0x35   :  { %s59_s17 = sshll.u32 %s965_s16, 4  ;;  %p909_p10 = scmp.ne.s32.totalorder %s1134_s5, %s908_s21  ;;  %s60_s17 = int_to_ptr.vmem [resolvable:$true] %s59_s17 }
  0x36   :  { %p912_p11 = scmp.lt.u32.totalorder %s908_s21, %s1134_s5 }
  0x38   :  { %p914_p12 = pnand %p912_p11, %p909_p10 }
  0x3a   :  { %917 = shalt.err (!%p914_p12)
}
  0x3b   :  { %s918_s1 = scalar_lea.vmem %s60_s17, 2048  ;;  %p923_p0 = scmp.lt.s32.totalorder %s60_s17, %s60_s17 }
  0x3c   :  { %p919_p13 = scmp.ne.s32.totalorder %s60_s17, %s918_s1  ;;  %p924_p1 = scmp.lt.s32.totalorder %s918_s1, %s918_s1 }
  0x3e   :  { %p925_p2 = por %p924_p1, %p923_p0 }
  0x40   :  { %p926_p3 = pnand %p925_p2, %p919_p13 }
  0x42   :  { %929 = shalt.err (!%p926_p3)
}
  0x43   :  { %s966_s3 = smov 128   ;;  %s967_s11 = smov 8  }
  0x44   :  { %65 = dma.hbm_to_vmem [thread:$0]  %s1134_s5, 2048, %s60_s17, [#allocation9], %s966_s3, %s966_s3, %s967_s11  }
  0x45   :  { %952 = dma.done.wait [#allocation3], 128  }
  0x46   :  { %953 = vsyncadd [#allocation3], 4294967168 }
  0x47   :  { %954 = dma.done.wait [#allocation6], 6912  }
  0x48   :  { %955 = vsyncadd [#allocation6], 4294960384 }
  0x49   :  { %956 = dma.done.wait [#allocation9], 2048  }
  0x4a   :  { %957 = vsyncadd [#allocation9], 4294965248  ;;  %v968_v0 = vmov 0.0   ;;  %v82_v1 = vld [vmem:[#allocation5 + $0x8] sm:$0xff]  ;;  %v85_v2 = vld [vmem:[#allocation5 + $0x20] sm:$0xff]  ;;  %vm104_vm0 = vcmask 130048  }
  0x4b   :  { %172 = vmatprep.mubr.f32.mxu1 %v968_v0  ;;  %394 = vmatprep.mubr.f32.mxu0 %v968_v0  ;;  %v81_v3 = vld [vmem:[#allocation5] sm:$0xff]  ;;  %v719_v4 = vpack.c.bf16 %v85_v2, %v82_v1  ;;  %v84_v5 = vld [vmem:[#allocation5 + $0x18] sm:$0xff]  ;;  %v83_v6 = vld [vmem:[#allocation5 + $0x10] sm:$0xff]  ;;  %v969_v11 = vmov 0.0|0.0   ;;  %vm970_vm1 = vmmov 0   ;;  %s971_s29 = smov [#allocation10]  }
  0x4c   :  { %v721_v7 = vpack.c.bf16 %v84_v5, %v81_v3  ;;  %v86_v8 = vld [vmem:[#allocation5 + $0x28] sm:$0xff]  ;;  %v80_v9 = vld [vmem:[#allocation2] sm:$0xff]  ;;  %v269_v13 = vld [vmem:[#allocation7 + $0x20] sm:$0xff]  ;;  %s587_s30 = sshll.u32 %s971_s29, 4  ;;  %s588_s30 = int_to_ptr.vmem [resolvable:$true] %s587_s30 }
  0x4d   :  { %720 = vmatprep.subr.bf16.mxu1 %v719_v4  ;;  %v724_v10 = vpack.c.bf16 %v86_v8, %v83_v6  ;;  %v266_v12 = vld [vmem:[#allocation7 + $0x8] sm:$0xff]  ;;  %v265_v15 = vld [vmem:[#allocation7] sm:$0xff]  ;;  %v268_v16 = vld [vmem:[#allocation7 + $0x18] sm:$0xff]  ;;  %s930_s8 = scalar_lea.vmem %s588_s30, 128  ;;  %p935_p5 = scmp.lt.s32.totalorder %s588_s30, %s588_s30 }
  0x4e   :  { %722 = vmatpush1.bf16.msra.mxu1 %v721_v7  ;;  %v726_v14 = vpack.c.bf16 %v269_v13, %v266_v12  ;;  %v267_v17 = vld [vmem:[#allocation7 + $0x10] sm:$0xff]  ;;  %v728_v18 = vpack.c.bf16 %v268_v16, %v265_v15  ;;  %v270_v19 = vld [vmem:[#allocation7 + $0x28] sm:$0xff]  ;;  %v272_v21 = vld [vmem:[#allocation7 + $0x38] sm:$0xff]  ;;  %p931_p4 = scmp.ne.s32.totalorder %s588_s30, %s930_s8  ;;  %p936_p6 = scmp.lt.s32.totalorder %s930_s8, %s930_s8 }
  0x4f   :  { %723 = vmatprep.subr.bf16.mxu1 %v969_v11  ;;  %v759_v20 = vpack.c.bf16 %v270_v19, %v267_v17  ;;  %v275_v22 = vld [vmem:[#allocation7 + $0x50] sm:$0xff]  ;;  %v274_v25 = vld [vmem:[#allocation7 + $0x48] sm:$0xff]  ;;  %v273_v26 = vld [vmem:[#allocation7 + $0x40] sm:$0xff] }
  0x50   :  { %727 = vmatprep.subr.bf16.mxu0 %v726_v14  ;;  %v730_v23 = vpack.c.bf16 %v275_v22, %v272_v21  ;;  %v271_v24 = vld [vmem:[#allocation7 + $0x30] sm:$0xff]  ;;  %v276_v28 = vld [vmem:[#allocation7 + $0x58] sm:$0xff]  ;;  %v278_v30 = vld [vmem:[#allocation7 + $0x68] sm:$0xff]  ;;  %v89_v22 = vlaneseq  ;;  %p937_p7 = por %p936_p6, %p935_p5 }
  0x51   :  { %598 = vmatmul.mubr.msk.f32.vlgmr.msra.gmra.mrb[0].mxu1 %vm104_vm0, %v80_v9  ;;  %729 = vmatpush1.bf16.msra.mxu0 %v728_v18  ;;  %v732_v27 = vpack.c.bf16 %v274_v25, %v271_v24  ;;  %v762_v29 = vpack.c.bf16 %v276_v28, %v273_v26  ;;  %v281_v31 = vld [vmem:[#allocation7 + $0x80] sm:$0xff]  ;;  %v280_v34 = vld [vmem:[#allocation7 + $0x78] sm:$0xff]  ;;  %v279_v35 = vld [vmem:[#allocation7 + $0x70] sm:$0xff] }
  0x52   :  { %725 = vmatpush3.bf16.msra.mxu1 %v724_v10  ;;  %646 = vmatprep.mubr.msk.f32.mxu1 %vm970_vm1, %v968_v0  ;;  %v734_v32 = vpack.c.bf16 %v281_v31, %v278_v30  ;;  %v277_v33 = vld [vmem:[#allocation7 + $0x60] sm:$0xff]  ;;  %v282_v37 = vld [vmem:[#allocation7 + $0x88] sm:$0xff]  ;;  %v284_v39 = vld [vmem:[#allocation7 + $0x98] sm:$0xff]  ;;  %p938_p8 = pnand %p937_p7, %p931_p4 }
  0x53   :  { %758 = vmatprep.subr.bf16.mxu1 %v969_v11  ;;  %731 = vmatprep.subr.bf16.mxu0 %v730_v23  ;;  %v736_v36 = vpack.c.bf16 %v280_v34, %v277_v33  ;;  %v765_v38 = vpack.c.bf16 %v282_v37, %v279_v35  ;;  %v287_v40 = vld [vmem:[#allocation7 + $0xb0] sm:$0xff]  ;;  %v286_v43 = vld [vmem:[#allocation7 + $0xa8] sm:$0xff]  ;;  %v285_v44 = vld [vmem:[#allocation7 + $0xa0] sm:$0xff]  ;;  %v1082_v23 = vshrl.u32 %v89_v22, 7 }
  0x54   :  { %v738_v41 = vpack.c.bf16 %v287_v40, %v284_v39  ;;  %v283_v42 = vld [vmem:[#allocation7 + $0x90] sm:$0xff]  ;;  %v288_v46 = vld [vmem:[#allocation7 + $0xb8] sm:$0xff]  ;;  %v290_v48 = vld [vmem:[#allocation7 + $0xc8] sm:$0xff] }
  0x55   :  { %647 = vmatmul.mubr.msk.f32.vlgmr.msra.gmra.mrb[2].mxu1 %vm104_vm0, %v80_v9  ;;  %733 = vmatpush1.bf16.msra.mxu0 %v732_v27  ;;  %v740_v45 = vpack.c.bf16 %v286_v43, %v283_v42  ;;  %v768_v47 = vpack.c.bf16 %v288_v46, %v285_v44  ;;  %v293_v49 = vld [vmem:[#allocation7 + $0xe0] sm:$0xff]  ;;  %v292_v52 = vld [vmem:[#allocation7 + $0xd8] sm:$0xff]  ;;  %v291_v53 = vld [vmem:[#allocation7 + $0xd0] sm:$0xff]  ;;  %v91_v24 = vsub.s32 0, %v1082_v23  ;;  %v99_v27 = vsub.s32 2, %v1082_v23 }
  0x56   :  { %681 = vmatprep.mubr.msk.f32.mxu1 %vm970_vm1, %v968_v0  ;;  %760 = vmatpush3.bf16.msra.mxu1 %v759_v20  ;;  %v742_v50 = vpack.c.bf16 %v293_v49, %v290_v48  ;;  %v289_v51 = vld [vmem:[#allocation7 + $0xc0] sm:$0xff]  ;;  %v294_v55 = vld [vmem:[#allocation7 + $0xe8] sm:$0xff]  ;;  %v296_v57 = vld [vmem:[#allocation7 + $0xf8] sm:$0xff]  ;;  %v95_v34 = vsub.s32 1, %v1082_v23 }
  0x57   :  { %761 = vmatprep.subr.bf16.mxu1 %v969_v11  ;;  %735 = vmatprep.subr.bf16.mxu0 %v734_v32  ;;  %v744_v54 = vpack.c.bf16 %v292_v52, %v289_v51  ;;  %v771_v56 = vpack.c.bf16 %v294_v55, %v291_v53  ;;  %v299_v58 = vld [vmem:[#allocation7 + $0x110] sm:$0xff]  ;;  %v298_v61 = vld [vmem:[#allocation7 + $0x108] sm:$0xff]  ;;  %v297_v62 = vld [vmem:[#allocation7 + $0x100] sm:$0xff] }
  0x58   :  { %v746_v59 = vpack.c.bf16 %v299_v58, %v296_v57  ;;  %v295_v60 = vld [vmem:[#allocation7 + $0xf0] sm:$0xff]  ;;  %v300_v1 = vld [vmem:[#allocation7 + $0x118] sm:$0xff]  ;;  %v302_v2 = vld [vmem:[#allocation7 + $0x128] sm:$0xff] }
  0x59   :  { %737 = vmatpush1.bf16.msra.mxu0 %v736_v36  ;;  %v748_v63 = vpack.c.bf16 %v298_v61, %v295_v60  ;;  %v305_v3 = vld [vmem:[#allocation7 + $0x140] sm:$0xff]  ;;  %v774_v4 = vpack.c.bf16 %v300_v1, %v297_v62  ;;  %v304_v7 = vld [vmem:[#allocation7 + $0x138] sm:$0xff]  ;;  %v303_v8 = vld [vmem:[#allocation7 + $0x130] sm:$0xff] }
  0x5a   :  { %763 = vmatpush3.bf16.msra.mxu1 %v762_v29  ;;  %739 = vmatprep.subr.bf16.mxu0 %v738_v41  ;;  %v750_v5 = vpack.c.bf16 %v305_v3, %v302_v2  ;;  %v301_v6 = vld [vmem:[#allocation7 + $0x120] sm:$0xff]  ;;  %v306_v10 = vld [vmem:[#allocation7 + $0x148] sm:$0xff]  ;;  %v308_v12 = vld [vmem:[#allocation7 + $0x158] sm:$0xff] }
  0x5b   :  { %764 = vmatprep.subr.bf16.mxu1 %v969_v11  ;;  %v752_v9 = vpack.c.bf16 %v304_v7, %v301_v6  ;;  %v311_v13 = vld [vmem:[#allocation7 + $0x170] sm:$0xff]  ;;  %v777_v14 = vpack.c.bf16 %v306_v10, %v303_v8  ;;  %v310_v17 = vld [vmem:[#allocation7 + $0x168] sm:$0xff]  ;;  %v309_v18 = vld [vmem:[#allocation7 + $0x160] sm:$0xff] }
  0x5c   :  { %v754_v15 = vpack.c.bf16 %v311_v13, %v308_v12  ;;  %v307_v16 = vld [vmem:[#allocation7 + $0x150] sm:$0xff]  ;;  %v312_v19 = vld [vmem:[#allocation7 + $0x178] sm:$0xff]  ;;  %v87_v25 = vld [vmem:[%s1131_s2] sm:$0x7] }
  0x5d   :  { %741 = vmatpush1.bf16.msra.mxu0 %v740_v45  ;;  %v756_v20 = vpack.c.bf16 %v310_v17, %v307_v16  ;;  %v780_v21 = vpack.c.bf16 %v312_v19, %v309_v18  ;;  %v92_v26 = vrot.slane %v87_v25, %v91_v24  ;;  %v100_v31 = vrot.slane %v87_v25, %v99_v27  ;;  %v488_v51 = vld [vmem:[#allocation8 + $0x8] sm:$0xff]  ;;  %v489_v53 = vld [vmem:[#allocation8 + $0x10] sm:$0xff]  ;;  %v495_v61 = vld [vmem:[#allocation8 + $0x40] sm:$0xff] }
  0x5e   :  { %766 = vmatpush3.bf16.msra.mxu1 %v765_v38  ;;  %743 = vmatprep.subr.bf16.mxu0 %v742_v50  ;;  %v96_v38 = vrot.slane %v87_v25, %v95_v34  ;;  %v487_v50 = vld [vmem:[#allocation8] sm:$0xff]  ;;  %v492_v57 = vld [vmem:[#allocation8 + $0x28] sm:$0xff]  ;;  %v497_v1 = vld [vmem:[#allocation8 + $0x50] sm:$0xff] }
  0x5f   :  { %767 = vmatprep.subr.bf16.mxu1 %v969_v11  ;;  %v783_v52 = vpack.c.bf16 %v488_v51, %v487_v50  ;;  %v496_v62 = vld [vmem:[#allocation8 + $0x48] sm:$0xff]  ;;  %v498_v2 = vld [vmem:[#allocation8 + $0x58] sm:$0xff]  ;;  %v499_v3 = vld [vmem:[#allocation8 + $0x60] sm:$0xff] }
  0x60   :  { %v501_v7 = vld [vmem:[#allocation8 + $0x70] sm:$0xff]  ;;  %v502_v8 = vld [vmem:[#allocation8 + $0x78] sm:$0xff]  ;;  %v313_v10 = vld [vmem:[%s1133_s4] sm:$0x7] }
  0x61   :  { %745 = vmatpush1.bf16.msra.mxu0 %v744_v54  ;;  %v490_v54 = vld [vmem:[#allocation8 + $0x18] sm:$0xff]  ;;  %v318_v12 = vrot.slane %v313_v10, %v91_v24  ;;  %v326_v16 = vrot.slane %v313_v10, %v99_v27  ;;  %v604_v23 = vld [vmem:[%s1135_s6] ss:$0 sm:$0xff] }
  0x62   :  { %769 = vmatpush3.bf16.msra.mxu1 %v768_v47  ;;  %747 = vmatprep.subr.bf16.mxu0 %v746_v59  ;;  %v786_v55 = vpack.c.bf16 %v490_v54, %v489_v53  ;;  %v493_v59 = vld [vmem:[#allocation8 + $0x30] sm:$0xff] }
  0x63   :  { %770 = vmatprep.subr.bf16.mxu1 %v969_v11 }
  0x65   :  { %749 = vmatpush1.bf16.msra.mxu0 %v748_v63  ;;  %v795_v63 = vpack.c.bf16 %v496_v62, %v495_v61 }
  0x66   :  { %772 = vmatpush3.bf16.msra.mxu1 %v771_v56  ;;  %751 = vmatprep.subr.bf16.mxu0 %v750_v5  ;;  %v491_v56 = vld [vmem:[#allocation8 + $0x20] sm:$0xff]  ;;  %v500_v5 = vld [vmem:[#allocation8 + $0x68] sm:$0xff] }
  0x67   :  { %773 = vmatprep.subr.bf16.mxu1 %v969_v11  ;;  %v789_v58 = vpack.c.bf16 %v492_v57, %v491_v56  ;;  %v801_v6 = vpack.c.bf16 %v500_v5, %v499_v3 }
  0x69   :  { %753 = vmatpush1.bf16.msra.mxu0 %v752_v9  ;;  %v804_v9 = vpack.c.bf16 %v502_v8, %v501_v7 }
  0x6a   :  { %775 = vmatpush3.bf16.msra.mxu1 %v774_v4  ;;  %755 = vmatprep.subr.bf16.mxu0 %v754_v15  ;;  %v798_v4 = vpack.c.bf16 %v498_v2, %v497_v1 }
  0x6b   :  { %776 = vmatprep.subr.bf16.mxu1 %v969_v11 }
  0x6d   :  { %757 = vmatpush1.bf16.msra.mxu0 %v756_v20 }
  0x6e   :  { %778 = vmatpush3.bf16.msra.mxu1 %v777_v14  ;;  %782 = vmatprep.subr.bf16.mxu0 %v969_v11 }
  0x6f   :  { %779 = vmatprep.subr.bf16.mxu1 %v969_v11 }
  0x72   :  { %781 = vmatpush3.bf16.msra.mxu1 %v780_v21  ;;  %v322_v21 = vrot.slane %v313_v10, %v95_v34 }
 0x124   :  { %v174_v28 = vpop.f32.mrb[0].mxu1 }
 0x125   :  { %v175_v29 = vadd.f32 %v174_v28, %v92_v26  ;;  %v176_v30 = vpop.f32.mrb[1].mxu1 }
 0x126   :  { %v177_v39 = vadd.f32 %v176_v30, %v96_v38 }
 0x127   :  { %v600_v32 = vmul.f32 -1.442695, %v175_v29 }
 0x128   :  { %v245_v33 = vpop.f32.mrb[2].mxu1 }
 0x129   :  { %818 = vpow2.f32 %v600_v32  ;;  %v246_v35 = vadd.f32 %v245_v33, %v100_v31  ;;  %v648_v36 = vpop.f32.mrb[3].mxu1 }
 0x12b   :  { %v601_v37 = vmul.f32 -1.442695, %v246_v35 }
 0x12d   :  { %820 = vpow2.f32 %v601_v37 }
 0x12e   :  { %822 = vtanh.f32 %v177_v39 }
 0x133   :  { %v819_v40 = vpop.eup %818 }
 0x134   :  { %v252_v41 = vadd.f32 1.0, %v819_v40 }
 0x136   :  { %824 = vrcp.f32 %v252_v41 }
 0x137   :  { %v821_v42 = vpop.eup %820 }
 0x138   :  { %v259_v43 = vadd.f32 1.0, %v821_v42  ;;  %v823_v44 = vpop.eup %822 }
 0x13a   :  { %826 = vrcp.f32 %v259_v43 }
 0x140   :  { %v825_v45 = vpop.eup %824 }
 0x141   :  { %v262_v46 = vmul.f32 %v825_v45, %v823_v44 }
 0x143   :  { %828 = vtanh.f32 %v262_v46 }
 0x144   :  { %v827_v47 = vpop.eup %826 }
 0x14d   :  { %v829_v48 = vpop.eup %828 }
 0x14e   :  { %v264_v49 = vmul.f32 %v829_v48, %v827_v47 }
 0x150   :  { %395 = vmatmul.mubr.f32.vlgmr.msra.gmra.mrb[0].mxu0 %v264_v49  ;;  %682 = vmatmul.mubr.f32.vlgmr.msra.gmra.mrb[4].mxu1 %v264_v49 }
 0x151   :  { %716 = vmatprep.mubr.msk.f32.mxu0 %vm970_vm1, %v968_v0  ;;  %784 = vmatpush3.bf16.msra.mxu0 %v783_v52  ;;  %v494_v0 = vld [vmem:[#allocation8 + $0x38] sm:$0xff] }
 0x152   :  { %785 = vmatprep.subr.bf16.mxu0 %v969_v11  ;;  %v792_v60 = vpack.c.bf16 %v494_v0, %v493_v59 }
 0x155   :  { %787 = vmatpush3.bf16.msra.mxu0 %v786_v55 }
 0x156   :  { %788 = vmatprep.subr.bf16.mxu0 %v969_v11 }
 0x159   :  { %790 = vmatpush3.bf16.msra.mxu0 %v789_v58 }
 0x15a   :  { %791 = vmatprep.subr.bf16.mxu0 %v969_v11 }
 0x15d   :  { %793 = vmatpush3.bf16.msra.mxu0 %v792_v60 }
 0x15e   :  { %794 = vmatprep.subr.bf16.mxu0 %v969_v11 }
 0x161   :  { %796 = vmatpush3.bf16.msra.mxu0 %v795_v63 }
 0x162   :  { %797 = vmatprep.subr.bf16.mxu0 %v969_v11 }
 0x165   :  { %799 = vmatpush3.bf16.msra.mxu0 %v798_v4 }
 0x166   :  { %800 = vmatprep.subr.bf16.mxu0 %v969_v11 }
 0x169   :  { %802 = vmatpush3.bf16.msra.mxu0 %v801_v6 }
 0x16a   :  { %803 = vmatprep.subr.bf16.mxu0 %v969_v11 }
 0x16d   :  { %805 = vmatpush3.bf16.msra.mxu0 %v804_v9 }
 0x223   :  { %v396_v13 = vpop.f32.mrb[0].mxu0  ;;  %v467_v14 = vpop.f32.mrb[4].mxu1 }
 0x224   :  { %v397_v15 = vadd.f32 %v396_v13, %v318_v12  ;;  %v398_v17 = vpop.f32.mrb[1].mxu0  ;;  %v683_v18 = vpop.f32.mrb[5].mxu1  ;;  %v468_v20 = vadd.f32 %v467_v14, %v326_v16 }
 0x225   :  { %v399_v22 = vadd.f32 %v398_v17, %v322_v21 }
 0x226   :  { %v602_v19 = vmul.f32 -1.442695, %v397_v15  ;;  %v603_v11 = vmul.f32 -1.442695, %v468_v20 }
 0x228   :  { %830 = vpow2.f32 %v602_v19 }
 0x229   :  { %832 = vpow2.f32 %v603_v11 }
 0x22a   :  { %834 = vtanh.f32 %v399_v22 }
 0x232   :  { %v831_v25 = vpop.eup %830 }
 0x233   :  { %v474_v26 = vadd.f32 1.0, %v831_v25  ;;  %v833_v24 = vpop.eup %832 }
 0x234   :  { %v481_v28 = vadd.f32 1.0, %v833_v24  ;;  %v835_v29 = vpop.eup %834 }
 0x235   :  { %836 = vrcp.f32 %v474_v26 }
 0x236   :  { %838 = vrcp.f32 %v481_v28 }
 0x23f   :  { %v837_v30 = vpop.eup %836 }
 0x240   :  { %v484_v27 = vmul.f32 %v837_v30, %v835_v29  ;;  %v839_v31 = vpop.eup %838 }
 0x242   :  { %840 = vtanh.f32 %v484_v27 }
 0x24c   :  { %v841_v32 = vpop.eup %840 }
 0x24d   :  { %v486_v33 = vmul.f32 %v841_v32, %v839_v31 }
 0x24f   :  { %717 = vmatmul.mubr.f32.vlgmr.msra.gmra.mrb[2].mxu0 %v486_v33 }
 0x322   :  { %v576_v34 = vpop.f32.mrb[2].mxu0 }
 0x323   :  { %v577_v35 = vadd.f32 %v604_v23, %v576_v34  ;;  %v718_v36 = vpop.f32.mrb[3].mxu0 }
 0x325   :  { %580 = vst [vmem:[#allocation10] sm:$0xff] %v577_v35 }
 0x326   :  { %941 = shalt.err (!%p938_p8)
}
 0x327   :  { %s942_s13 = scalar_lea.hbm %s1136_s7, 128 }
 0x328   :  { %p943_p9 = scmp.ne.s32.totalorder %s1136_s7, %s942_s13  ;;  %p946_p10 = scmp.lt.u32.totalorder %s942_s13, %s1136_s7 }
 0x32a   :  { %p948_p11 = pnand %p946_p10, %p943_p9 }
 0x32c   :  { %951 = shalt.err (!%p948_p11)
}
 0x32d   :  { %590 = dma.vmem_to_hbm [thread:$0]  %s588_s30, 128, %s1136_s7, [#allocation4]  }
 0x32e   :  { %958 = dma.done.wait [#allocation4], 128  }
 0x32f   :  { %959 = vsyncadd [#allocation4], 4294967168 }
 0x330   :  { %594 = vsyncpa [#allocation3], 1 }
 0x331   :  { %595 = vsyncpa [#allocation6], 1 }
 0x332   :  { %596 = vsyncpa [#allocation9], 1 }
 0x333   :  { %597 = vsyncpa [#allocation4], 1 }

</bundles_post_ra>
